<compile_context>
chip_gen: v7x
topology: tpu7x:2x2x1
jax: 0.10.0
libtpu: 0.0.40
codegen_flags: <defaults>
</compile_context>

<pallas_src>
import functools

import jax
import jax.numpy as jnp
from jax.experimental import pallas as pl
from jax.experimental.pallas import tpu as pltpu


def _pos_enc_kernel(x_ref, pe_ref, o_ref):
    # x_ref:  (1, ts, D)   block of the input (one batch row, ts positions)
    # pe_ref: (ts, D)      matching rows of the positional table; its block
    #                      index is constant across the inner (batch) grid
    #                      axis, so it is fetched once per seq tile.
    # o_ref:  (1, ts, D)
    o_ref[...] = (x_ref[...] + pe_ref[...]).astype(o_ref.dtype)


def make_positional_encoding_table(d_model, max_len=5000, dtype=jnp.float32):
    """Builds the same buffer PyTorch's PositionalEncoding registers at __init__."""
    position = jnp.arange(max_len, dtype=jnp.float32)[:, None]            # (L, 1)
    div_term = jnp.exp(
        jnp.arange(0, d_model, 2, dtype=jnp.float32)
        * (-jnp.log(10000.0) / d_model))                                  # (D//2,)
    angles = position * div_term                                          # (L, D//2)
    pe = jnp.zeros((max_len, d_model), jnp.float32)
    pe = pe.at[:, 0::2].set(jnp.sin(angles))
    pe = pe.at[:, 1::2].set(jnp.cos(angles))
    return pe.astype(dtype)


def _sublane_pack(dtype):
    """Sublane packing factor: 8 for f32, 16 for bf16, 32 for int8."""
    return max(8, 32 // jnp.dtype(dtype).itemsize)


def _pick_seq_tile(seq_len, d_model, dtype,
                   vmem_block_budget=12 * 1024 * 1024, max_tile=2048):
    """Rows of the sequence processed per grid step.

    Sized so 3 streams (x, pe, out) x 2 pipeline buffers of (ts, D) blocks fit
    in `vmem_block_budget` bytes (safe under v5e's 16 MiB default scoped VMEM;
    v6e/v7x default to 32 MiB), rounded to the sublane pack so blocks satisfy
    the (8, 128) tiling rule, and capped so the leading (parallel) seq axis
    keeps >= 2 grid steps for v7x's two TensorCores.
    """
    pack = _sublane_pack(dtype)
    if seq_len <= pack:
        return seq_len                              # full-dim block: always legal
    itemsize = jnp.dtype(dtype).itemsize
    bytes_per_row = 6 * d_model * itemsize          # 3 streams x 2 buffers
    ts = min(max_tile, max(pack, vmem_block_budget // bytes_per_row))
    # Keep at least two seq tiles so the parallel axis can be sharded on v7x.
    half = -(-seq_len // 2)                         # ceil(seq_len / 2)
    half = -(-half // pack) * pack                  # round up to sublane pack
    ts = min(ts, half, seq_len)
    ts = max(pack, (ts // pack) * pack)             # round down to sublane pack
    return int(ts)


@functools.partial(jax.jit, static_argnames=("ts",))
def positional_encoding_pallas(x, pe, *, ts=None):
    """x: (batch, seq, d_model); pe: (max_len, d_model). Returns x + pe[:seq]."""
    B, S, D = x.shape
    max_len = pe.shape[0]
    assert S <= max_len, "sequence longer than the positional table"

    # Stream pe in x's dtype so the add doesn't promote in-vreg and pe bytes
    # aren't doubled for bf16 activations (no-op when dtypes already match).
    pe = pe.astype(x.dtype)

    if ts is None:
        ts = _pick_seq_tile(S, D, x.dtype)
    num_s = pl.cdiv(S, ts)
    # Seq tiles outer (parallel), batch innermost: pe block index is constant
    # across the inner axis -> no redundant pe re-fetch per batch row.
    grid = (num_s, B)

    return pl.pallas_call(
        _pos_enc_kernel,
        out_shape=jax.ShapeDtypeStruct((B, S, D), x.dtype),
        grid_spec=pltpu.PrefetchScalarGridSpec(
            num_scalar_prefetch=0,
            grid=grid,
            in_specs=[
                # x block: one batch row, ts positions, full d_model
                # (full last dim => lane-dense, unmasked vst when D % 128 == 0).
                pl.BlockSpec((1, ts, D), lambda s, b: (b, s, 0)),
                # pe block: same ts positions, batch-independent (constant
                # across the inner grid axis).
                pl.BlockSpec((ts, D), lambda s, b: (s, 0)),
            ],
            out_specs=pl.BlockSpec((1, ts, D), lambda s, b: (b, s, 0)),
        ),
        compiler_params=pltpu.CompilerParams(
            dimension_semantics=("parallel", "parallel"),
        ),
    )(x, pe)


if __name__ == "__main__":
    key = jax.random.PRNGKey(0)
    batch, seq, d_model, max_len = 2, 64, 128, 512

    pe = make_positional_encoding_table(d_model, max_len)

    # Case 1: aligned sequence length.
    x = jax.random.normal(key, (batch, seq, d_model), jnp.float32)
    y = positional_encoding_pallas(x, pe)
    jax.block_until_ready(y)
    y_ref = x + pe[None, :seq, :]
    assert y.shape == x.shape
    assert jnp.allclose(y, y_ref, atol=1e-6, rtol=1e-6)

    # Case 2: ragged sequence length (exercises the cdiv / partial-tile path).
    seq2 = 60
    x2 = jax.random.normal(jax.random.PRNGKey(1), (batch, seq2, d_model), jnp.float32)
    y2 = positional_encoding_pallas(x2, pe)
    jax.block_until_ready(y2)
    y2_ref = x2 + pe[None, :seq2, :]
    assert y2.shape == x2.shape
    assert jnp.allclose(y2, y2_ref, atol=1e-6, rtol=1e-6)

    print("KERNEL_OK")
</pallas_src>

<mosaic_0001>
module attributes {stable_mosaic.version = 11 : i64} {
  func.func @_pos_enc_kernel(%arg0: i32, %arg1: i32, %arg2: memref<1x32x128xf32, #tpu.memory_space<vmem>>, %arg3: memref<32x128xf32, #tpu.memory_space<vmem>>, %arg4: memref<1x32x128xf32, #tpu.memory_space<vmem>>) attributes {dimension_semantics = [#tpu.dimension_semantics<parallel>, #tpu.dimension_semantics<parallel>], iteration_bounds = array<i64: 2, 2>, scalar_prefetch = 0 : i64, scratch_operands = 0 : i64, tpu.core_type = #tpu.core_type<tc>, window_params = [{transform_indices = @transform_0, window_bounds = array<i64: 1, 32, 128>}, {transform_indices = @transform_1, window_bounds = array<i64: 32, 128>}, {transform_indices = @transform_2, window_bounds = array<i64: 1, 32, 128>}]} {
    %c0 = arith.constant 0 : index
    %c0_0 = arith.constant 0 : index
    %c0_1 = arith.constant 0 : index
    %0 = vector.load %arg2[%c0, %c0_0, %c0_1] : memref<1x32x128xf32, #tpu.memory_space<vmem>>, vector<1x32x128xf32>
    %c0_2 = arith.constant 0 : index
    %c0_3 = arith.constant 0 : index
    %1 = vector.load %arg3[%c0_2, %c0_3] : memref<32x128xf32, #tpu.memory_space<vmem>>, vector<32x128xf32>
    %2 = vector.shape_cast %1 : vector<32x128xf32> to vector<1x32x128xf32>
    %3 = arith.addf %0, %2 : vector<1x32x128xf32>
    %c0_4 = arith.constant 0 : index
    %c0_5 = arith.constant 0 : index
    %c0_6 = arith.constant 0 : index
    %4 = vector.load %arg4[%c0_4, %c0_5, %c0_6] : memref<1x32x128xf32, #tpu.memory_space<vmem>>, vector<1x32x128xf32>
    tpu.vector_store %arg4[%c0_4, %c0_5, %c0_6], %3 {strides = array<i32>} : memref<1x32x128xf32, #tpu.memory_space<vmem>>, vector<1x32x128xf32>,
    return
  }
  func.func @transform_0(%arg0: i32, %arg1: i32) -> (i32, i32, i32) {
    %c0_i32 = arith.constant 0 : i32
    %c0_i32_0 = arith.constant 0 : i32
    return %arg1, %arg0, %c0_i32 : i32, i32, i32
  }
  func.func @transform_1(%arg0: i32, %arg1: i32) -> (i32, i32) {
    %c0_i32 = arith.constant 0 : i32
    %c0_i32_0 = arith.constant 0 : i32
    return %arg0, %c0_i32 : i32, i32
  }
  func.func @transform_2(%arg0: i32, %arg1: i32) -> (i32, i32, i32) {
    %c0_i32 = arith.constant 0 : i32
    %c0_i32_0 = arith.constant 0 : i32
    return %arg1, %arg0, %c0_i32 : i32, i32, i32
  }
}

</mosaic_0001>

<bundles_post_ra>
// kernel: positional_encoding_pallas.1
= control target key start
LH: loop header
LB: loop body
LE: loop exit
PB: predicated region body
PF: predicated region fallthrough
CT: control target
= control target key end

     0   :  { %s1024_s0 = inlined_call_operand.hbm [shape: f32[2,64,128], index: 0, kind: input, shape index: {}]   ;;  %s1025_s1 = inlined_call_operand.hbm [shape: f32[512,128], index: 1, kind: input, shape index: {}]   ;;  %s1026_s2 = inlined_call_operand.hbm [shape: f32[2,64,128], index: 2, kind: output, shape index: {}]  }
   0x1   :  { %1038 = sst [smem:[#allocation14_spill]] %s1026_s2 }
   0x2   :  { %7 = vsyncpa [#allocation3], 0 }
   0x3   :  { %9 = vsyncpa [#allocation3 + $0x1], 0 }
   0x4   :  { %10 = vsyncpa [#allocation6], 0 }
   0x5   :  { %12 = vsyncpa [#allocation6 + $0x1], 0 }
   0x6   :  { %13 = vsyncpa [#allocation4], 0 }
   0x7   :  { %15 = vsyncpa [#allocation4 + $0x1], 0  ;;  %s711_s9 = smov 0   ;;  %s713_s10 = smov 0  }
   0x8   :  { %s715_s11 = smov 0   ;;  %s717_s12 = smov 0  }
   0x9   :  { %s719_s13 = smov 0   ;;  %s721_s14 = smov 0  }
   0xa   :  { %s723_s15 = smov 0   ;;  %s725_s16 = smov 0  }
   0xb   :  { %s727_s17 = smov 0   ;;  %s729_s18 = smov 0  }
   0xc   :  { %s731_s19 = smov 0  }
   0xd LB: > { %1039 = sst [smem:[#allocation11_spill]] %s659_s12  ;;  %s368_s20 = sadd.s32 4294967295, %s687_s19   ;;  %s687_s19 = sphi %s731_s19, %s21_s19   ;;  %s683_s18 = sphi %s729_s18, %s1074_s18   ;;  %s679_s17 = sphi %s727_s17, %s1073_s17   ;;  %s675_s16 = sphi %s725_s16, %s1072_s16   ;;  %s671_s15 = sphi %s723_s15, %s1071_s15   ;;  %s667_s14 = sphi %s721_s14, %s1070_s14   ;;  %s663_s13 = sphi %s719_s13, %s1069_s13   ;;  %s659_s12 = sphi %s717_s12, %s1068_s12   ;;  %s655_s11 = sphi %s715_s11, %s1067_s11   ;;  %s651_s10 = sphi %s713_s10, %s1066_s10   ;;  %s647_s9 = sphi %s711_s9, %s1065_s9  }
   0xe   : > { %s369_s21 = sadd.s32 4294967294, %s687_s19   ;;  %s30_s22 = sadd.s32 1, %s679_s17 }
   0xf   : > { %s33_s23 = sadd.s32 1, %s683_s18  ;;  %p31_p0 = scmp.ge.s32.totalorder %s30_s22, 2 }
  0x10   : > { %s42_s24 = sadd.s32 1, %s667_s14  ;;  %p49_p1 = scmp.ne.s32.totalorder %s667_s14, %s663_s13 }
  0x11   : > { %p1032_p2 = scmp.eq.s32.totalorder %s687_s19, 0  ;;  %s1076_s22 = smov (%p31_p0, %s30_s22), 0 }
  0x12   : > { %1040 = sst [smem:[#allocation12_spill]] %s1076_s22  ;;  %s1078_s23 = smov (!%p31_p0, %s33_s23), %s683_s18 }
  0x13   : > { %s37_s25 = ssub.s32 %s679_s17, %s1076_s22  ;;  %p781_p3 = por %p1032_p2, %p49_p1 }
  0x14   : > { %p35_p4 = scmp.ge.s32.totalorder %s1078_s23, 2  ;;  %p55_p5 = scmp.ne.s32.totalorder %s663_s13, %s659_s12 }
  0x15   : > { %p787_p6 = scmp.eq.s32.totalorder %s368_s20, 0  ;;  %p107_p7 = scmp.eq.s32.totalorder %s368_s20, 3 }
  0x16   : > { %s1080_s23 = smov (%p35_p4, %s1078_s23), 0  ;;  %p113_p10 = scmp.eq.s32.totalorder %s369_s21, 3 }
  0x17   : > { %1043 = sst [smem:[#allocation13_spill]] %s1080_s23  ;;  %p795_p8 = por %p787_p6, %p55_p5 }
  0x18   : > { %p799_p9 = por %p107_p7, %p49_p1  ;;  %s805_s30 = ssub.s32 %s683_s18, %s1080_s23 }
  0x19   : > { %s1044_s28 = scalar_select %p795_p8, 1, 0 }
  0x1a   : > { %s1045_s29 = scalar_select %p799_p9, 1, 0 }
  0x1b   : > { %s39_s3 = sor.u32 %s805_s30, %s37_s25  ;;  %p809_p13 = por %p113_p10, %p55_p5 }
  0x1c   : > { %p40_p12 = scmp.eq.s32.totalorder %s39_s3, 0  ;;  %p1031_p0 = scmp.lt.s32.totalorder %s687_s19, 4 }
  0x1d   : > { %s1046_s4 = scalar_select %p809_p13, 1, 0 }
  0x1e   : > { %s815_s5 = scalar_select %p40_p12, %s667_s14, %s42_s24  }
  0x1f   : > { %s133_s6 = sand.u32 1, %s667_s14   ;;  %s373_s7 = sshll.u32 %s683_s18, 2 }
  0x20   : > { %s372_s8 = sshll.u32 %s133_s6, 5  ;;  %s374_s20 = sshll.u32 %s679_s17, 3 }
  0x21   : > { %s143_s23 = sadd.s32 %s374_s20, %s373_s7  ;;  %s137_s22 = scalar_lea.vmem [#allocation2], %s372_s8 }
  0x22   : > { %s146_s21 = sshll.u32 %s137_s22, 4  ;;  %s375_s25 = sshll.u32 %s143_s23, 7  ;;  %s820_s21 = int_to_ptr.vmem [resolvable:$true] %s146_s21 }
  0x23   : > { %s825_s3 = scalar_lea.hbm %s1024_s0, %s375_s25  ;;  %p831_p1 = pnand %p1031_p0, %p781_p3 }
  0x24   : > { %s836_s22 = scalar_lea.sflag [#allocation3], %s133_s6  ;;  %s501_s23 = scalar_lea.hbm %s825_s3, 512 }
  0x25   : > { %p502_p5 = scmp.ne.s32.totalorder %s825_s3, %s501_s23  ;;  %p503_p7 = pneg %p831_p1 }
  0x26   : > { %s506_s26 = scalar_lea.hbm %s1024_s0, 2048  ;;  %p507_p3 = scmp.lt.u32.totalorder %s825_s3, %s1024_s0 }
  0x27   : > { %p504_p10 = pnand %p503_p7, %p502_p5  ;;  %p508_p0 = scmp.lt.u32.totalorder %s506_s26, %s501_s23 }
  0x28   : > { %p510_p11 = scmp.lt.u32.totalorder %s501_s23, %s825_s3 }
  0x29   : > { %p505_p12 = pneg %p504_p10  ;;  %p509_p2 = por %p508_p0, %p507_p3 }
  0x2b   : > { %p511_p4 = por %p510_p11, %p509_p2 }
  0x2d   : > { %p512_p13 = pnand %p511_p4, %p505_p12 }
  0x2f   : > { %515 = shalt.err (!%p512_p13)
}
  0x30   : > { %s516_s6 = scalar_lea.vmem %s820_s21, 512  ;;  %s689_s20 = smov [#allocation2]  }
  0x31   : > { %p517_p5 = scmp.ne.s32.totalorder %s820_s21, %s516_s6  ;;  %s521_s25 = sshll.u32 %s689_s20, 4  ;;  %s522_s25 = int_to_ptr.vmem [resolvable:$false] %s521_s25 }
  0x32   : > { %s523_s2 = scalar_lea.vmem %s522_s25, 1024  ;;  %p524_p8 = scmp.lt.s32.totalorder %s820_s21, %s522_s25 }
  0x33   : > { %p519_p10 = pnand %p517_p5, %p503_p7  ;;  %p525_p0 = scmp.lt.s32.totalorder %s523_s2, %s516_s6 }
  0x35   : > { %p520_p9 = pneg %p519_p10  ;;  %p526_p3 = por %p525_p0, %p524_p8 }
  0x37   : > { %p527_p2 = pnand %p526_p3, %p520_p9 }
  0x39   : > { %530 = shalt.err (!%p527_p2)
}
  0x3a   : > { %s1035_s23 = smov 128   ;;  %s1036_s12 = smov 8  }
  0x3b   : > { %399 = dma.hbm_to_vmem [thread:$0]  (!%p831_p1), %s825_s3, 512, %s820_s21, %s836_s22, %s1035_s23, %s1035_s23, %s1036_s12  }
  0x3c   : > { %p175_p8 = scmp.lt.s32.totalorder %s687_s19, 5  ;;  %p1048_p9 = scmp.ge.s32.totalorder %s687_s19, 1 }
  0x3d   : > { %s68_s7 = sadd.s32 1, %s655_s11  ;;  %p75_p13 = scmp.ne.s32.totalorder %s655_s11, %s651_s10 }
  0x3e   : > { %p870_p11 = pnand %p1048_p9, %p175_p8  ;;  %p1050_p4 = scmp.eq.s32.totalorder %s805_s30, 0 }
  0x3f   : > { %p1051_p7 = scmp.eq.s32.totalorder %s687_s19, 0  ;;  %p81_p5 = scmp.ne.s32.totalorder %s651_s10, %s647_s9 }
  0x40   : > { %s880_s8 = scalar_select %p1050_p4, %s655_s11, %s68_s7  }
  0x41   : > { %p77_p12 = por %p75_p13, %p1051_p7  ;;  %s156_s6 = sand.u32 1, %s655_s11  }
  0x42   : > { %s389_s24 = sshll.u32 %s683_s18, 9  ;;  %p890_p10 = por %p81_p5, %p787_p6 }
  0x43   : > { %s376_s21 = sshll.u32 %s156_s6, 5  ;;  %s897_s25 = scalar_lea.hbm %s1025_s1, %s389_s24 }
  0x44   : > { %s1052_s20 = scalar_select %p890_p10, 1, 0 }
  0x45   : > { %p1053_p1 = scmp.lt.s32.totalorder %s687_s19, 4  ;;  %s160_s27 = scalar_lea.vmem [#allocation5], %s376_s21 }
  0x46   : > { %s167_s30 = sshll.u32 %s160_s27, 4  ;;  %s907_s2 = scalar_lea.sflag [#allocation6], %s156_s6  ;;  %s905_s30 = int_to_ptr.vmem [resolvable:$true] %s167_s30 }
  0x47   : > { %p901_p0 = pnand %p1053_p1, %p77_p12  ;;  %s531_s7 = scalar_lea.hbm %s897_s25, 512 }
  0x48   : > { %p532_p6 = scmp.ne.s32.totalorder %s897_s25, %s531_s7  ;;  %s536_s22 = scalar_lea.hbm %s1025_s1, 8192 }
  0x49   : > { %p533_p3 = pneg %p901_p0  ;;  %p537_p9 = scmp.lt.u32.totalorder %s897_s25, %s1025_s1 }
  0x4a   : > { %p538_p13 = scmp.lt.u32.totalorder %s536_s22, %s531_s7  ;;  %p540_p7 = scmp.lt.u32.totalorder %s531_s7, %s897_s25 }
  0x4b   : > { %p534_p2 = pnand %p533_p3, %p532_p6 }
  0x4c   : > { %p539_p4 = por %p538_p13, %p537_p9 }
  0x4d   : > { %p535_p8 = pneg %p534_p2 }
  0x4e   : > { %p541_p12 = por %p540_p7, %p539_p4 }
  0x50   : > { %p542_p5 = pnand %p541_p12, %p535_p8 }
  0x52   : > { %545 = shalt.err (!%p542_p5)
}
  0x53   : > { %s546_s6 = scalar_lea.vmem %s905_s30, 512  ;;  %s692_s21 = smov [#allocation5]  }
  0x54   : > { %p547_p1 = scmp.ne.s32.totalorder %s905_s30, %s546_s6  ;;  %s551_s27 = sshll.u32 %s692_s21, 4  ;;  %s552_s27 = int_to_ptr.vmem [resolvable:$false] %s551_s27 }
  0x55   : > { %s553_s23 = scalar_lea.vmem %s552_s27, 1024  ;;  %p554_p10 = scmp.lt.s32.totalorder %s905_s30, %s552_s27 }
  0x56   : > { %p549_p6 = pnand %p547_p1, %p533_p3  ;;  %p555_p9 = scmp.lt.s32.totalorder %s553_s23, %s546_s6 }
  0x58   : > { %p550_p2 = pneg %p549_p6  ;;  %p556_p13 = por %p555_p9, %p554_p10 }
  0x5a   : > { %p557_p4 = pnand %p556_p13, %p550_p2 }
  0x5c   : > { %560 = shalt.err (!%p557_p4)
}
  0x5d   : > { %s1055_s12 = smov 8   ;;  %s1056_s7 = smov 128  }
  0x5e   : > { %402 = dma.hbm_to_vmem [thread:$0]  (!%p901_p0), %s897_s25, 512, %s905_s30, %s907_s2, %s1056_s7, %s1056_s7, %s1055_s12  }
  0x5f   : > { %179 = sbr.rel (%p870_p11) target bundleno = 135 (0x87), region = 28  ;;  %s941_s24 = sand.u32 (!%p870_p11), 1, %s663_s13  }
  0x60   : > { %s380_s3 = sshll.u32 (!%p870_p11), %s941_s24, 5  ;;  %s182_s22 = scalar_lea.sflag (!%p870_p11), [#allocation3], %s941_s24 }
  0x61   : > { %s185_s6 = scalar_lea.vmem (!%p870_p11), [#allocation2], %s380_s3  ;;  %p1057_p10 = scmp.ne.s32.totalorder (!%p870_p11), %s1044_s28, 0 }
  0x66   : > { %634 = dma.done.wait (%p1057_p10), %s182_s22, 512  }
  0x67   : > { %636 = vsyncadd (%p1057_p10), %s182_s22, 4294966784  ;;  %s190_s25 = sand.u32 1, %s651_s10   ;;  %p1058_p11 = scmp.ne.s32.totalorder %s1052_s20, 0 }
  0x68   : > { %s381_s9 = sshll.u32 %s190_s25, 5  ;;  %s191_s26 = scalar_lea.sflag [#allocation6], %s190_s25 }
  0x69   : > { %s194_s30 = scalar_lea.vmem [#allocation5], %s381_s9 }
  0x6a   : > { %638 = dma.done.wait (%p1058_p11), %s191_s26, 512  }
  0x6b   : > { %640 = vsyncadd (%p1058_p11), %s191_s26, 4294966784  ;;  %s384_s2 = sshll.u32 %s675_s16, 2  ;;  %s385_s21 = sshll.u32 %s671_s15, 3  ;;  %v223_v0 = vld [vmem:[%s185_s6] sm:$0xff]  ;;  %v224_v2 = vld [vmem:[%s185_s6 + $0x8] sm:$0xff] }
  0x6c   : > { %s252_s27 = sadd.s32 %s385_s21, %s384_s2  ;;  %s219_s23 = scalar_lea.vmem [#allocation7], %s380_s3  ;;  %v227_v1 = vld [vmem:[%s194_s30] sm:$0xff]  ;;  %v228_v4 = vld [vmem:[%s194_s30 + $0x8] sm:$0xff]  ;;  %v225_v5 = vld [vmem:[%s185_s6 + $0x10] sm:$0xff] }
  0x6d   : > { %s255_s12 = sshll.u32 %s219_s23, 4  ;;  %s386_s28 = sshll.u32 %s252_s27, 7  ;;  %v231_v3 = vadd.f32 %v227_v1, %v223_v0  ;;  %v229_v6 = vld [vmem:[%s194_s30 + $0x10] sm:$0xff]  ;;  %v232_v7 = vadd.f32 %v228_v4, %v224_v2  ;;  %v226_v9 = vld [vmem:[%s185_s6 + $0x18] sm:$0xff]  ;;  %s956_s12 = int_to_ptr.vmem [resolvable:$true] %s255_s12 }
  0x6e   : > { %v233_v8 = vadd.f32 %v229_v6, %v225_v5  ;;  %v230_v10 = vld [vmem:[%s194_s30 + $0x18] sm:$0xff]  ;;  %s1059_s20 = sld [smem:[#allocation14_spill]]  ;;  %s240_s3 = scalar_lea.sflag [#allocation4], %s941_s24 }
  0x6f   : > { %235 = vst [vmem:[%s219_s23] sm:$0xff] %v231_v3  ;;  %v234_v11 = vadd.f32 %v230_v10, %v226_v9  ;;  %236 = vst [vmem:[%s219_s23 + $0x8] sm:$0xff] %v232_v7  ;;  %s561_s22 = scalar_lea.vmem %s956_s12, 512  ;;  %p1060_p3 = scmp.ne.s32.totalorder %s1045_s29, 0 }
  0x70   : > { %237 = vst [vmem:[%s219_s23 + $0x10] sm:$0xff] %v233_v8  ;;  %p562_p0 = scmp.ne.s32.totalorder %s956_s12, %s561_s22  ;;  %s693_s25 = smov [#allocation7]  }
  0x71   : > { %238 = vst [vmem:[%s219_s23 + $0x18] sm:$0xff] %v234_v11  ;;  %s565_s6 = sshll.u32 %s693_s25, 4  ;;  %s566_s6 = int_to_ptr.vmem [resolvable:$false] %s565_s6 }
  0x72   : > { %p563_p8 = pnand %p562_p0, %p1060_p3  ;;  %s567_s9 = scalar_lea.vmem %s566_s6, 1024 }
  0x73   : > { %p568_p12 = scmp.lt.s32.totalorder %s956_s12, %s566_s6  ;;  %p569_p5 = scmp.lt.s32.totalorder %s567_s9, %s561_s22 }
  0x74   : > { %s961_s7 = scalar_lea.hbm %s1059_s20, %s386_s28  ;;  %p564_p7 = pneg %p563_p8 }
  0x75   : > { %p570_p1 = por %p569_p5, %p568_p12 }
  0x77   : > { %p571_p6 = pnand %p570_p1, %p564_p7 }
  0x79   : > { %574 = shalt.err (!%p571_p6)
}
  0x7a   : > { %s575_s26 = scalar_lea.hbm %s961_s7, 512  ;;  %s579_s21 = scalar_lea.hbm %s1059_s20, 2048 }
  0x7b   : > { %p576_p2 = scmp.ne.s32.totalorder %s961_s7, %s575_s26  ;;  %p580_p4 = scmp.lt.u32.totalorder %s961_s7, %s1059_s20 }
  0x7c   : > { %p581_p10 = scmp.lt.u32.totalorder %s579_s21, %s575_s26  ;;  %p583_p0 = scmp.lt.u32.totalorder %s575_s26, %s961_s7 }
  0x7d   : > { %p577_p9 = pnand %p576_p2, %p1060_p3 }
  0x7e   : > { %p582_p11 = por %p581_p10, %p580_p4 }
  0x7f   : > { %p578_p13 = pneg %p577_p9 }
  0x80   : > { %p584_p8 = por %p583_p0, %p582_p11 }
  0x82   : > { %p585_p7 = pnand %p584_p8, %p578_p13 }
  0x84   : > { %588 = shalt.err (!%p585_p7)
}
  0x85   : > { %s694_s28 = smov 128   ;;  %s695_s15 = smov 8  }
  0x86   : > { %394 = dma.vmem_to_hbm [thread:$0]  (%p1060_p3), %s956_s12, 512, %s961_s7, %s240_s3, %s694_s28, %s694_s28, %s695_s15  }
  0x87 PF: > { %s1061_s16 = sld [smem:[#allocation11_spill]]  ;;  %p408_p12 = scmp.ge.s32.totalorder %s687_s19, 2 }
  0x88   : > { %p1062_p5 = scmp.ne.s32.totalorder %s1046_s4, 0 }
  0x8a   : > { %p404_p1 = pnand %p408_p12, %p1062_p5 }
  0x8d   : > { %s270_s22 = sand.u32 1, %s1061_s16  }
  0x8e   : > { %s271_s25 = scalar_lea.sflag [#allocation4], %s270_s22 }
  0x8f   : > { %642 = dma.done.wait (!%p404_p1), %s271_s25, 512  }
  0x90   : > { %644 = vsyncadd (!%p404_p1), %s271_s25, 4294966784  ;;  %s21_s19 = sadd.s32 1, %s687_s19   ;;  %s1063_s29 = sld [smem:[#allocation12_spill]] }
  0x91   : > { %p18_p6 = scmp.ge.s32.totalorder %s21_s19, 6   ;;  %s1064_s24 = sld [smem:[#allocation13_spill]] }
  0x92   : > { %s1065_s9 = smov %s651_s10  ;;  %s1066_s10 = smov %s655_s11 }
  0x93   : > { %s1067_s11 = smov %s880_s8  ;;  %s1068_s12 = smov %s663_s13 }
  0x94   : > { %s1069_s13 = smov %s667_s14  ;;  %s1070_s14 = smov %s815_s5 }
  0x95   : > { %s1071_s15 = smov %s679_s17  ;;  %s1072_s16 = smov %s683_s18 }
  0x96   : > { %s1073_s17 = smov %s1063_s29  ;;  %20 = sbr.rel (!%p18_p6) target bundleno = 13 (0xd), region = 86 }
  0x97   : > { %s1074_s18 = smov %s1064_s24 }
  0x9d   :  { %276 = vsyncpa [#allocation3], 1 }
  0x9e   :  { %278 = vsyncpa [#allocation3 + $0x1], 1 }
  0x9f   :  { %279 = vsyncpa [#allocation6], 1 }
  0xa0   :  { %281 = vsyncpa [#allocation6 + $0x1], 1 }
  0xa1   :  { %282 = vsyncpa [#allocation4], 1 }
  0xa2   :  { %284 = vsyncpa [#allocation4 + $0x1], 1 }

</bundles_post_ra>
